<compile_context>
chip_gen: v6e
topology: v6e:2x2x1
jax: 0.10.0
libtpu: 0.0.40
codegen_flags: <defaults>
</compile_context>

<pallas_src>
import functools

import jax
import jax.numpy as jnp
from jax import lax
from jax.experimental import pallas as pl
from jax.experimental.pallas import tpu as pltpu


# ----------------------------------------------------------------------------
# Kernels
# ----------------------------------------------------------------------------

def _select_w_t_kernel(prob_ref, th_w_ref, w_ref, w_upd_ref, o_ref):
    """o[(k,j) block] = where(th_w > prob, weight, weight_upd).T  (cast to mm dtype).

    w_ref / w_upd_ref: (ts_n, ts_k) blocks of the (N, K)-layout weights.
    th_w_ref:          (1, ts_k) block of the per-in_features threshold.
    o_ref:             (ts_k, ts_n) block of eff_w^T (K, N layout).
    """
    p = prob_ref[0, 0]                                    # SMEM scalar
    sel = jnp.where(th_w_ref[...] > p, w_ref[...], w_upd_ref[...])
    o_ref[...] = sel.T.astype(o_ref.dtype)                # transpose here: XLU is idle


def _matmul_bias_kernel(x_ref, w_ref, b_ref, o_ref, *, precision):
    """o[i,j] (f32, resident across k) = bias + sum_k x[i,k] @ eff_w^T[k,j]."""
    k = pl.program_id(2)

    @pl.when(k == 0)
    def _init():
        # Initialize the resident f32 output tile with the broadcast bias —
        # no separate accumulator scratch needed.
        o_ref[...] = jnp.broadcast_to(b_ref[...], o_ref.shape)

    o_ref[...] += lax.dot_general(
        x_ref[...], w_ref[...],
        dimension_numbers=(((1,), (0,)), ((), ())),        # canonical (m,k)x(k,n)
        preferred_element_type=jnp.float32,
        precision=precision)


# ----------------------------------------------------------------------------
# Wrapper helpers
# ----------------------------------------------------------------------------

def _round_up(x, m):
    return (x + m - 1) // m * m


def _pad2d(a, rows, cols):
    pr, pc = rows - a.shape[0], cols - a.shape[1]
    if pr == 0 and pc == 0:
        return a                                           # no copy when aligned
    return jnp.pad(a, ((0, pr), (0, pc)))


def _pick_tile(dim, candidates):
    """Largest candidate whose padding waste stays within ~dim/8 of the best."""
    wastes = {t: _round_up(dim, t) - dim for t in candidates}
    slack = max(min(wastes.values()), dim // 8)
    for t in sorted(candidates, reverse=True):
        if wastes[t] <= slack:
            return t
    return min(candidates)


def _divisor_tile(dim, cap, candidates):
    """Full dim if small enough, else the largest candidate that divides it."""
    if dim <= cap:
        return dim
    for c in candidates:
        if dim % c == 0:
            return c
    return 128


# ----------------------------------------------------------------------------
# Public entry point
# ----------------------------------------------------------------------------

@functools.partial(jax.jit, static_argnames=("matmul_dtype",))
def rft_linear(x, weight, weight_upd, bias, bias_upd, th_w, th_b,
               prob=0.005, *, matmul_dtype=jnp.bfloat16):
    """Pallas implementation of RFTLinear.forward (mask_type=1, dynamic=False).

    x:                  (..., in_features) float32
    weight, weight_upd: (out_features, in_features) float32
    bias, bias_upd:     (out_features,) float32
    th_w:               (in_features,) float32
    th_b:               (1,) float32
    prob:               scalar threshold
    matmul_dtype:       bf16 (default, MXU-native) or float32 (strict parity,
                        lowered with precision=HIGHEST).
    """
    orig_shape = x.shape
    N, K = weight.shape
    x2d = x.reshape(-1, K).astype(jnp.float32)
    M = x2d.shape[0]

    mm_dtype = jnp.dtype(matmul_dtype)
    mm_isz = mm_dtype.itemsize
    precision = (lax.Precision.HIGHEST
                 if mm_dtype == jnp.dtype(jnp.float32) else None)

    # ---- tile choice: minimize padding waste, keep lane-dense N/K tiles ----
    tm = _pick_tile(M, (1024, 512, 256, 128, 64, 32, 16))
    tn = _pick_tile(N, (512, 256, 128))
    tk = _pick_tile(K, (1024, 512, 256, 128))
    Mp, Np, Kp = _round_up(M, tm), _round_up(N, tn), _round_up(K, tk)

    # ---- stage-2 weight blocking: resident eff_w^T when it fits VMEM --------
    def stage2_vmem(tm_, wk_, wn_):
        # double-buffered x + weight + output + bias tiles
        return 2 * (tm_ * wk_ * mm_isz + wk_ * wn_ * mm_isz
                    + tm_ * wn_ * 4 + wn_ * 4)

    vmem_cap = 44 * 1024 * 1024          # budget against v7x 64 MiB/TC VMEM
    weight_resident = (2 * Kp * Np * mm_isz <= 16 * 1024 * 1024
                       and stage2_vmem(tm, Kp, Np) <= vmem_cap)
    if weight_resident:
        wk, wn = Kp, Np                  # constant block index -> fetched once
    else:
        wk, wn = tk, tn
        if Mp // tm == 1 and Np // wn == 1 and Np >= 256:
            wn = 128                     # keep >=2 parallel steps for v7x megacore

    # ---- pad only when actually misaligned (zeros are matmul-neutral) ------
    x_p = _pad2d(x2d.astype(mm_dtype), Mp, Kp)
    w_p = _pad2d(weight.astype(jnp.float32), Np, Kp)
    wu_p = _pad2d(weight_upd.astype(jnp.float32), Np, Kp)
    thw_p = _pad2d(th_w.reshape(1, K).astype(jnp.float32), 1, Kp)

    # Bias select is a scalar-gated (N,) where -> do it in XLA, pass one array.
    eff_b = jnp.where(th_b[0] > prob, bias, bias_upd).astype(jnp.float32)
    b_p = _pad2d(eff_b.reshape(1, N), 1, Np)

    prob_s = jnp.asarray(prob, dtype=jnp.float32).reshape(1, 1)   # SMEM scalar
    smem = pl.BlockSpec(memory_space=pltpu.MemorySpace.SMEM)

    # --- Stage 1: static-mask weight select, transposed + cast --------------
    ts_n = _divisor_tile(Np, 512, (512, 256, 128))
    ts_k = _divisor_tile(Kp, 1024, (1024, 512, 256, 128))
    vmem1 = min(48 << 20,
                max(2 * (2 * ts_n * ts_k * 4 + ts_k * ts_n * mm_isz) + (2 << 20),
                    32 << 20))

    eff_w_t = pl.pallas_call(
        _select_w_t_kernel,
        out_shape=jax.ShapeDtypeStruct((Kp, Np), mm_dtype),
        grid=(Np // ts_n, Kp // ts_k),
        in_specs=[
            smem,                                               # prob
            pl.BlockSpec((1, ts_k), lambda j, k: (0, k)),       # th_w
            pl.BlockSpec((ts_n, ts_k), lambda j, k: (j, k)),    # weight
            pl.BlockSpec((ts_n, ts_k), lambda j, k: (j, k)),    # weight_upd
        ],
        out_specs=pl.BlockSpec((ts_k, ts_n), lambda j, k: (k, j)),
        compiler_params=pltpu.CompilerParams(
            dimension_semantics=("parallel", "parallel"),
            vmem_limit_bytes=vmem1),
    )(prob_s, thw_p, w_p, wu_p)

    # --- Stage 2: tiled matmul, bias folded into the k==0 init --------------
    vmem2 = min(48 << 20, max(stage2_vmem(tm, wk, wn) + (2 << 20), 32 << 20))
    cost = pl.CostEstimate(
        flops=2 * Mp * Np * Kp,
        transcendentals=0,
        bytes_accessed=(Mp * Kp * mm_isz + Np * Kp * mm_isz + Mp * Np * 4 + Np * 4),
    )

    out = pl.pallas_call(
        functools.partial(_matmul_bias_kernel, precision=precision),
        out_shape=jax.ShapeDtypeStruct((Mp, Np), jnp.float32),
        grid=(Mp // tm, Np // wn, Kp // wk),
        in_specs=[
            pl.BlockSpec((tm, wk), lambda i, j, k: (i, k)),     # x (mm dtype)
            pl.BlockSpec((wk, wn), lambda i, j, k: (k, j)),     # eff_w^T (mm dtype)
            pl.BlockSpec((1, wn), lambda i, j, k: (0, j)),      # effective bias (f32)
        ],
        out_specs=pl.BlockSpec((tm, wn), lambda i, j, k: (i, j)),
        compiler_params=pltpu.CompilerParams(
            dimension_semantics=("parallel", "parallel", "arbitrary"),
            vmem_limit_bytes=vmem2),
        cost_estimate=cost,
    )(x_p, eff_w_t, b_p)

    out = out[:M, :N]
    return out.reshape(*orig_shape[:-1], N)


# ----------------------------------------------------------------------------
# Reference + test
# ----------------------------------------------------------------------------

def _reference(x, weight, weight_upd, bias, bias_upd, th_w, th_b, prob=0.005):
    keep_w = (th_w > prob).astype(jnp.float32)          # (K,)
    w_eff = weight * keep_w + weight_upd * (1.0 - keep_w)
    keep_b = (th_b > prob).astype(jnp.float32)          # (1,)
    b_eff = bias * keep_b + bias_upd * (1.0 - keep_b)
    y = jnp.einsum("...k,nk->...n", x, w_eff, precision=jax.lax.Precision.HIGHEST)
    return y + b_eff


if __name__ == "__main__":
    import math

    key = jax.random.PRNGKey(0)
    batch, seq = 2, 8
    in_features, out_features = 32, 64
    prob = 0.25  # higher than 0.005 at these tiny sizes so both branches are exercised

    k_x, k_w, k_wu, k_b, k_bu, k_tw, k_tb = jax.random.split(key, 7)

    fan_in = in_features
    bound_w = math.sqrt(6.0 / fan_in)
    bound_b = 1.0 / math.sqrt(fan_in)

    x = jax.random.normal(k_x, (batch, seq, in_features), dtype=jnp.float32)
    weight = jax.random.uniform(k_w, (out_features, in_features),
                                minval=-bound_w, maxval=bound_w, dtype=jnp.float32)
    weight_upd = jax.random.uniform(k_wu, (out_features, in_features),
                                    minval=-bound_w, maxval=bound_w, dtype=jnp.float32)
    bias = jax.random.uniform(k_b, (out_features,),
                              minval=-bound_b, maxval=bound_b, dtype=jnp.float32)
    bias_upd = jax.random.uniform(k_bu, (out_features,),
                                  minval=-bound_b, maxval=bound_b, dtype=jnp.float32)
    th_w = jax.random.uniform(k_tw, (in_features,), dtype=jnp.float32)
    th_b = jax.random.uniform(k_tb, (1,), dtype=jnp.float32)

    y_ref = _reference(x, weight, weight_upd, bias, bias_upd, th_w, th_b, prob=prob)

    # bf16-rounded reference (same operand truncation as the default kernel path)
    def _bf16(a):
        return a.astype(jnp.bfloat16).astype(jnp.float32)
    y_ref_bf16 = _reference(_bf16(x), _bf16(weight), _bf16(weight_upd),
                            bias, bias_upd, th_w, th_b, prob=prob)

    # Default path: bf16 MXU operands, f32 accumulation / output.
    y = rft_linear(x, weight, weight_upd, bias, bias_upd, th_w, th_b, prob=prob)
    y = jax.block_until_ready(y)
    assert y.shape == (batch, seq, out_features), y.shape
    assert jnp.allclose(y, y_ref_bf16, atol=1e-3, rtol=1e-3), "bf16 path vs bf16 reference"
    assert jnp.allclose(y, y_ref, atol=5e-2, rtol=5e-2), "bf16 path vs f32 reference"

    # Strict-f32 parity path (precision=HIGHEST on the MXU).
    y32 = rft_linear(x, weight, weight_upd, bias, bias_upd, th_w, th_b, prob=prob,
                     matmul_dtype=jnp.float32)
    y32 = jax.block_until_ready(y32)
    assert y32.shape == (batch, seq, out_features), y32.shape
    assert jnp.allclose(y32, y_ref, atol=1e-4, rtol=1e-4), "f32 path vs f32 reference"

    print("KERNEL_OK")
</pallas_src>

<mosaic_0001>
module attributes {stable_mosaic.version = 11 : i64} {
  func.func @_select_w_t_kernel(%arg0: i32, %arg1: i32, %arg2: memref<1x1xf32, #tpu.memory_space<smem>>, %arg3: memref<1x128xf32, #tpu.memory_space<vmem>>, %arg4: memref<128x128xf32, #tpu.memory_space<vmem>>, %arg5: memref<128x128xf32, #tpu.memory_space<vmem>>, %arg6: memref<128x128xbf16, #tpu.memory_space<vmem>>) attributes {dimension_semantics = [#tpu.dimension_semantics<parallel>, #tpu.dimension_semantics<parallel>], iteration_bounds = array<i64: 1, 1>, scalar_prefetch = 0 : i64, scratch_operands = 0 : i64, tpu.core_type = #tpu.core_type<tc>, window_params = [{transform_indices = @transform_0, window_bounds = array<i64: 1, 1>}, {transform_indices = @transform_1, window_bounds = array<i64: 1, 128>}, {transform_indices = @transform_2, window_bounds = array<i64: 128, 128>}, {transform_indices = @transform_3, window_bounds = array<i64: 128, 128>}, {transform_indices = @transform_4, window_bounds = array<i64: 128, 128>}]} {
    %c0 = arith.constant 0 : index
    %c0_0 = arith.constant 0 : index
    %0 = memref.load %arg2[%c0, %c0_0] : memref<1x1xf32, #tpu.memory_space<smem>>
    %c0_1 = arith.constant 0 : index
    %c0_2 = arith.constant 0 : index
    %1 = vector.load %arg3[%c0_1, %c0_2] : memref<1x128xf32, #tpu.memory_space<vmem>>, vector<1x128xf32>
    %2 = vector.broadcast %0 : f32 to vector<1x128xf32>
    %3 = arith.cmpf ogt, %1, %2 : vector<1x128xf32>
    %c0_3 = arith.constant 0 : index
    %c0_4 = arith.constant 0 : index
    %4 = vector.load %arg4[%c0_3, %c0_4] : memref<128x128xf32, #tpu.memory_space<vmem>>, vector<128x128xf32>
    %c0_5 = arith.constant 0 : index
    %c0_6 = arith.constant 0 : index
    %5 = vector.load %arg5[%c0_5, %c0_6] : memref<128x128xf32, #tpu.memory_space<vmem>>, vector<128x128xf32>
    %6 = vector.shape_cast %3 : vector<1x128xi1> to vector<1x128xi1>
    %7 = vector.broadcast %6 : vector<1x128xi1> to vector<128x128xi1>
    %8 = arith.select %7, %4, %5 : vector<128x128xi1>, vector<128x128xf32>
    %9 = tpu.transpose %8, [1, 0] : vector<128x128xf32> -> vector<128x128xf32>
    %10 = arith.truncf %9 : vector<128x128xf32> to vector<128x128xbf16>
    %c0_7 = arith.constant 0 : index
    %c0_8 = arith.constant 0 : index
    %11 = vector.load %arg6[%c0_7, %c0_8] : memref<128x128xbf16, #tpu.memory_space<vmem>>, vector<128x128xbf16>
    tpu.vector_store %arg6[%c0_7, %c0_8], %10 {strides = array<i32>} : memref<128x128xbf16, #tpu.memory_space<vmem>>, vector<128x128xbf16>,
    return
  }
  func.func @transform_0(%arg0: i32, %arg1: i32) -> (i32, i32) {
    %c0_i32 = arith.constant 0 : i32
    %c0_i32_0 = arith.constant 0 : i32
    %c0_i32_1 = arith.constant 0 : i32
    return %c0_i32, %c0_i32_0 : i32, i32
  }
  func.func @transform_1(%arg0: i32, %arg1: i32) -> (i32, i32) {
    %c0_i32 = arith.constant 0 : i32
    %c0_i32_0 = arith.constant 0 : i32
    return %c0_i32, %arg1 : i32, i32
  }
  func.func @transform_2(%arg0: i32, %arg1: i32) -> (i32, i32) {
    %c0_i32 = arith.constant 0 : i32
    return %arg0, %arg1 : i32, i32
  }
  func.func @transform_3(%arg0: i32, %arg1: i32) -> (i32, i32) {
    %c0_i32 = arith.constant 0 : i32
    return %arg0, %arg1 : i32, i32
  }
  func.func @transform_4(%arg0: i32, %arg1: i32) -> (i32, i32) {
    %c0_i32 = arith.constant 0 : i32
    return %arg1, %arg0 : i32, i32
  }
}

module attributes {stable_mosaic.version = 11 : i64} {
  func.func @_matmul_bias_kernel(%arg0: i32, %arg1: i32, %arg2: i32, %arg3: memref<16x128xbf16, #tpu.memory_space<vmem>>, %arg4: memref<128x128xbf16, #tpu.memory_space<vmem>>, %arg5: memref<1x128xf32, #tpu.memory_space<vmem>>, %arg6: memref<16x128xf32, #tpu.memory_space<vmem>>) attributes {dimension_semantics = [#tpu.dimension_semantics<parallel>, #tpu.dimension_semantics<parallel>, #tpu.dimension_semantics<arbitrary>], iteration_bounds = array<i64: 1, 1, 1>, scalar_prefetch = 0 : i64, scratch_operands = 0 : i64, tpu.core_type = #tpu.core_type<tc>, window_params = [{transform_indices = @transform_0, window_bounds = array<i64: 16, 128>}, {transform_indices = @transform_1, window_bounds = array<i64: 128, 128>}, {transform_indices = @transform_2, window_bounds = array<i64: 1, 128>}, {transform_indices = @transform_3, window_bounds = array<i64: 16, 128>}]} {
    %c0_i32 = arith.constant 0 : i32
    %0 = arith.cmpi eq, %arg2, %c0_i32 : i32
    %1 = arith.extui %0 : i1 to i32
    %c0_i32_0 = arith.constant 0 : i32
    %2 = arith.cmpi ne, %1, %c0_i32_0 : i32
    scf.if %2 {
      %c0_8 = arith.constant 0 : index
      %c0_9 = arith.constant 0 : index
      %9 = vector.load %arg5[%c0_8, %c0_9] : memref<1x128xf32, #tpu.memory_space<vmem>>, vector<1x128xf32>
      %10 = vector.shape_cast %9 : vector<1x128xf32> to vector<1x128xf32>
      %11 = vector.broadcast %10 : vector<1x128xf32> to vector<16x128xf32>
      %c0_10 = arith.constant 0 : index
      %c0_11 = arith.constant 0 : index
      %12 = vector.load %arg6[%c0_10, %c0_11] : memref<16x128xf32, #tpu.memory_space<vmem>>, vector<16x128xf32>
      tpu.vector_store %arg6[%c0_10, %c0_11], %11 {strides = array<i32>} : memref<16x128xf32, #tpu.memory_space<vmem>>, vector<16x128xf32>,
    } else {
    }
    %c0 = arith.constant 0 : index
    %c0_1 = arith.constant 0 : index
    %3 = vector.load %arg6[%c0, %c0_1] : memref<16x128xf32, #tpu.memory_space<vmem>>, vector<16x128xf32>
    %c0_2 = arith.constant 0 : index
    %c0_3 = arith.constant 0 : index
    %4 = vector.load %arg3[%c0_2, %c0_3] : memref<16x128xbf16, #tpu.memory_space<vmem>>, vector<16x128xbf16>
    %c0_4 = arith.constant 0 : index
    %c0_5 = arith.constant 0 : index
    %5 = vector.load %arg4[%c0_4, %c0_5] : memref<128x128xbf16, #tpu.memory_space<vmem>>, vector<128x128xbf16>
    %cst = arith.constant dense<0.000000e+00> : vector<16x128xf32>
    %6 = tpu.matmul %4, %5, %cst {dimension_numbers = #tpu.dot_dimension_numbers<[1], [0], [0], [1], [0, 0, 1, 1], [], []>} : vector<16x128xbf16>, vector<128x128xbf16>, vector<16x128xf32> -> vector<16x128xf32>
    %7 = arith.addf %3, %6 : vector<16x128xf32>
    %c0_6 = arith.constant 0 : index
    %c0_7 = arith.constant 0 : index
    %8 = vector.load %arg6[%c0_6, %c0_7] : memref<16x128xf32, #tpu.memory_space<vmem>>, vector<16x128xf32>
    tpu.vector_store %arg6[%c0_6, %c0_7], %7 {strides = array<i32>} : memref<16x128xf32, #tpu.memory_space<vmem>>, vector<16x128xf32>,
    return
  }
  func.func @transform_0(%arg0: i32, %arg1: i32, %arg2: i32) -> (i32, i32) {
    %c0_i32 = arith.constant 0 : i32
    return %arg0, %arg2 : i32, i32
  }
  func.func @transform_1(%arg0: i32, %arg1: i32, %arg2: i32) -> (i32, i32) {
    %c0_i32 = arith.constant 0 : i32
    return %arg2, %arg1 : i32, i32
  }
  func.func @transform_2(%arg0: i32, %arg1: i32, %arg2: i32) -> (i32, i32) {
    %c0_i32 = arith.constant 0 : i32
    %c0_i32_0 = arith.constant 0 : i32
    return %c0_i32, %arg1 : i32, i32
  }
  func.func @transform_3(%arg0: i32, %arg1: i32, %arg2: i32) -> (i32, i32) {
    %c0_i32 = arith.constant 0 : i32
    return %arg0, %arg1 : i32, i32
  }
}

</mosaic_0001>

<bundles_post_ra>
// kernel: rft_linear.2
= control target key start
LH: loop header
LB: loop body
LE: loop exit
PB: predicated region body
PF: predicated region fallthrough
CT: control target
= control target key end

     0   :  { %v55_v0 = vlaneseq  ;;  %v272_v4 = vmov 0   ;;  %s459_s0 = inlined_call_operand.<no memory space> [shape: f32[1,1], index: 0, kind: input, shape index: {}]   ;;  %s460_s1 = inlined_call_operand.vmem [shape: f32[1,128], index: 1, kind: input, shape index: {}]   ;;  %s461_s2 = inlined_call_operand.vmem [shape: f32[128,128], index: 2, kind: input, shape index: {}]   ;;  %s462_s3 = inlined_call_operand.vmem [shape: f32[128,128], index: 3, kind: input, shape index: {}]   ;;  %s463_s4 = inlined_call_operand.vmem [shape: bf16[128,128], index: 4, kind: output, shape index: {}]  }
   0x1   :  { %v19_v1 = vld [vmem:[%s460_s1] sm:$0x1]  ;;  %v20_v2 = vstv %s459_s0  ;;  %v23_v10 = vld [vmem:[%s461_s2 + $0x8] sm:$0xff]  ;;  %v24_v14 = vld [vmem:[%s461_s2 + $0x10] sm:$0xff] }
   0x2   :  { %vm21_vm0 = vcmp.gt.f32.partialorder %v19_v1, %v20_v2  ;;  %v56_v3 = vshrl.u32 %v55_v0, 7  ;;  %v22_v7 = vld [vmem:[%s461_s2] sm:$0xff]  ;;  %v39_v11 = vld [vmem:[%s462_s3 + $0x8] sm:$0xff]  ;;  %v40_v15 = vld [vmem:[%s462_s3 + $0x10] sm:$0xff] }
   0x3   :  { %v54_v5 = vsel %vm21_vm0, 1, %v272_v4  ;;  %v38_v8 = vld [vmem:[%s462_s3] sm:$0xff]  ;;  %v25_v17 = vld [vmem:[%s461_s2 + $0x18] sm:$0xff]  ;;  %v27_v23 = vld [vmem:[%s461_s2 + $0x28] sm:$0xff] }
   0x4   :  { %v57_v6 = vsub.s32 0, %v56_v3  ;;  %v41_v18 = vld [vmem:[%s462_s3 + $0x18] sm:$0xff]  ;;  %v26_v20 = vld [vmem:[%s461_s2 + $0x20] sm:$0xff]  ;;  %v43_v24 = vld [vmem:[%s462_s3 + $0x28] sm:$0xff] }
   0x5   :  { %v42_v21 = vld [vmem:[%s462_s3 + $0x20] sm:$0xff]  ;;  %v28_v26 = vld [vmem:[%s461_s2 + $0x30] sm:$0xff]  ;;  %v29_v29 = vld [vmem:[%s461_s2 + $0x38] sm:$0xff] }
   0x6   :  { %v310_v9 = vrot.slane %v54_v5, %v57_v6  ;;  %v44_v27 = vld [vmem:[%s462_s3 + $0x30] sm:$0xff]  ;;  %v45_v30 = vld [vmem:[%s462_s3 + $0x38] sm:$0xff]  ;;  %v30_v32 = vld [vmem:[%s461_s2 + $0x40] sm:$0xff] }
   0x7   :  { %v46_v33 = vld [vmem:[%s462_s3 + $0x40] sm:$0xff]  ;;  %v31_v35 = vld [vmem:[%s461_s2 + $0x48] sm:$0xff]  ;;  %v32_v38 = vld [vmem:[%s461_s2 + $0x50] sm:$0xff] }
   0x8   :  { %vm59_vm1 = vcmp.eq.s32.totalorder %v310_v9, 1  ;;  %v47_v36 = vld [vmem:[%s462_s3 + $0x48] sm:$0xff]  ;;  %v48_v39 = vld [vmem:[%s462_s3 + $0x50] sm:$0xff]  ;;  %v33_v41 = vld [vmem:[%s461_s2 + $0x58] sm:$0xff] }
   0x9   :  { %v60_v12 = vsel %vm59_vm1, %v22_v7, %v38_v8  ;;  %v61_v13 = vsel %vm59_vm1, %v23_v10, %v39_v11  ;;  %v62_v16 = vsel %vm59_vm1, %v24_v14, %v40_v15  ;;  %v63_v19 = vsel %vm59_vm1, %v25_v17, %v41_v18  ;;  %v49_v42 = vld [vmem:[%s462_s3 + $0x58] sm:$0xff]  ;;  %v34_v44 = vld [vmem:[%s461_s2 + $0x60] sm:$0xff]  ;;  %v35_v47 = vld [vmem:[%s461_s2 + $0x68] sm:$0xff] }
   0xa   :  { %76 = vxpose.xlu0.b32.start [1/16] %v60_v12, 128  ;;  %v64_v22 = vsel %vm59_vm1, %v26_v20, %v42_v21  ;;  %v65_v25 = vsel %vm59_vm1, %v27_v23, %v43_v24  ;;  %v66_v28 = vsel %vm59_vm1, %v28_v26, %v44_v27  ;;  %v67_v31 = vsel %vm59_vm1, %v29_v29, %v45_v30  ;;  %v50_v45 = vld [vmem:[%s462_s3 + $0x60] sm:$0xff]  ;;  %v51_v48 = vld [vmem:[%s462_s3 + $0x68] sm:$0xff]  ;;  %v36_v50 = vld [vmem:[%s461_s2 + $0x70] sm:$0xff] }
   0xb   :  { %v68_v34 = vsel %vm59_vm1, %v30_v32, %v46_v33  ;;  %v69_v37 = vsel %vm59_vm1, %v31_v35, %v47_v36  ;;  %v70_v40 = vsel %vm59_vm1, %v32_v38, %v48_v39  ;;  %v71_v43 = vsel %vm59_vm1, %v33_v41, %v49_v42  ;;  %v52_v51 = vld [vmem:[%s462_s3 + $0x70] sm:$0xff]  ;;  %v37_v53 = vld [vmem:[%s461_s2 + $0x78] sm:$0xff] }
   0xc   :  { %v72_v46 = vsel %vm59_vm1, %v34_v44, %v50_v45  ;;  %v73_v49 = vsel %vm59_vm1, %v35_v47, %v51_v48  ;;  %v74_v52 = vsel %vm59_vm1, %v36_v50, %v52_v51  ;;  %v53_v54 = vld [vmem:[%s462_s3 + $0x78] sm:$0xff] }
   0xd   :  { %v75_v55 = vsel %vm59_vm1, %v37_v53, %v53_v54 }
   0xe   :  { %77 = vxpose.xlu0.b32.cont [2/16] %v61_v13, 128 }
  0x12   :  { %78 = vxpose.xlu0.b32.cont [3/16] %v62_v16, 128 }
  0x16   :  { %79 = vxpose.xlu0.b32.cont [4/16] %v63_v19, 128 }
  0x1a   :  { %80 = vxpose.xlu0.b32.cont [5/16] %v64_v22, 128 }
  0x1e   :  { %81 = vxpose.xlu0.b32.cont [6/16] %v65_v25, 128 }
  0x22   :  { %82 = vxpose.xlu0.b32.cont [7/16] %v66_v28, 128 }
  0x26   :  { %83 = vxpose.xlu0.b32.cont [8/16] %v67_v31, 128 }
  0x2a   :  { %84 = vxpose.xlu0.b32.cont [9/16] %v68_v34, 128 }
  0x2e   :  { %85 = vxpose.xlu0.b32.cont [10/16] %v69_v37, 128 }
  0x32   :  { %86 = vxpose.xlu0.b32.cont [11/16] %v70_v40, 128 }
  0x36   :  { %87 = vxpose.xlu0.b32.cont [12/16] %v71_v43, 128 }
  0x3a   :  { %88 = vxpose.xlu0.b32.cont [13/16] %v72_v46, 128 }
  0x3e   :  { %89 = vxpose.xlu0.b32.cont [14/16] %v73_v49, 128 }
  0x42   :  { %90 = vxpose.xlu0.b32.cont [15/16] %v74_v52, 128 }
  0x46   :  { %91 = vxpose.xlu0.b32.end [16/16] %v75_v55, 128 }
  0x86   :  { %v92_v56 = vpop.trf.xlu0 }
  0x8a   :  { %v93_v57 = vpop.trf.xlu0 }
  0x8b   :  { %v227_v58 = vpack.c.bf16 %v93_v57, %v92_v56 }
  0x8d   :  { %228 = vst [vmem:[%s463_s4] sm:$0xff] %v227_v58  }
  0x8e   :  { %v94_v59 = vpop.trf.xlu0 }
  0x92   :  { %v95_v60 = vpop.trf.xlu0 }
  0x93   :  { %v232_v61 = vpack.c.bf16 %v95_v60, %v94_v59 }
  0x95   :  { %264 = vst [vmem:[%s463_s4 + $0x8] sm:$0xff] %v232_v61  }
  0x96   :  { %v96_v62 = vpop.trf.xlu0 }
  0x9a   :  { %v97_v63 = vpop.trf.xlu0 }
  0x9b   :  { %v237_v0 = vpack.c.bf16 %v97_v63, %v96_v62 }
  0x9d   :  { %265 = vst [vmem:[%s463_s4 + $0x10] sm:$0xff] %v237_v0  }
  0x9e   :  { %v98_v1 = vpop.trf.xlu0 }
  0xa2   :  { %v99_v2 = vpop.trf.xlu0 }
  0xa3   :  { %v242_v3 = vpack.c.bf16 %v99_v2, %v98_v1 }
  0xa5   :  { %266 = vst [vmem:[%s463_s4 + $0x18] sm:$0xff] %v242_v3  }
  0xa6   :  { %v100_v4 = vpop.trf.xlu0 }
  0xaa   :  { %v101_v5 = vpop.trf.xlu0 }
  0xab   :  { %v247_v6 = vpack.c.bf16 %v101_v5, %v100_v4 }
  0xad   :  { %267 = vst [vmem:[%s463_s4 + $0x20] sm:$0xff] %v247_v6  }
  0xae   :  { %v102_v7 = vpop.trf.xlu0 }
  0xb2   :  { %v103_v8 = vpop.trf.xlu0 }
  0xb3   :  { %v252_v9 = vpack.c.bf16 %v103_v8, %v102_v7 }
  0xb5   :  { %268 = vst [vmem:[%s463_s4 + $0x28] sm:$0xff] %v252_v9  }
  0xb6   :  { %v104_v10 = vpop.trf.xlu0 }
  0xba   :  { %v105_v11 = vpop.trf.xlu0 }
  0xbb   :  { %v257_v12 = vpack.c.bf16 %v105_v11, %v104_v10 }
  0xbd   :  { %269 = vst [vmem:[%s463_s4 + $0x30] sm:$0xff] %v257_v12  }
  0xbe   :  { %v106_v13 = vpop.trf.xlu0 }
  0xc2   :  { %v107_v14 = vpop.trf.xlu0 }
  0xc3   :  { %v262_v15 = vpack.c.bf16 %v107_v14, %v106_v13 }
  0xc5   :  { %270 = vst [vmem:[%s463_s4 + $0x38] sm:$0xff] %v262_v15  }

// kernel: rft_linear.3
= control target key start
LH: loop header
LB: loop body
LE: loop exit
PB: predicated region body
PF: predicated region fallthrough
CT: control target
= control target key end

     0   :  { %v201_v0 = vmov 0.0   ;;  %vm202_vm0 = vmmov 0   ;;  %s259_s1 = inlined_call_operand.vmem [shape: bf16[128,128], index: 1, kind: input, shape index: {}]   ;;  %s260_s0 = inlined_call_operand.vmem [shape: bf16[16,128], index: 0, kind: input, shape index: {}]   ;;  %s261_s2 = inlined_call_operand.vmem [shape: f32[1,128], index: 2, kind: input, shape index: {}]   ;;  %s262_s3 = inlined_call_operand.vmem [shape: f32[16,128], index: 3, kind: output, shape index: {}]  }
   0x1   :  { %170 = vmatprep.subr.bf16.mxu0 %v201_v0  ;;  %v192_v1 = vld [vmem:[%s259_s1 + $0x38] sm:$0xff]   ;;  %186 = vmatprep.mubr.msk.bf16.mxu0 %vm202_vm0, %v201_v0  ;;  %v193_v2 = vld [vmem:[%s259_s1 + $0x30] sm:$0xff]   ;;  %v194_v3 = vld [vmem:[%s259_s1 + $0x28] sm:$0xff]  }
   0x2   :  { %171 = vmatpush3.bf16.msra.mxu0 %v192_v1  ;;  %v195_v4 = vld [vmem:[%s259_s1 + $0x20] sm:$0xff]   ;;  %v196_v5 = vld [vmem:[%s259_s1 + $0x18] sm:$0xff]   ;;  %v197_v6 = vld [vmem:[%s259_s1 + $0x10] sm:$0xff]  }
   0x3   :  { %172 = vmatprep.subr.bf16.mxu0 %v201_v0  ;;  %v198_v7 = vld [vmem:[%s259_s1 + $0x8] sm:$0xff]   ;;  %v199_v8 = vld [vmem:[%s259_s1] sm:$0xff]  }
   0x4   :  { %v200_v9 = vld [vmem:[%s260_s0] sm:$0xff]  }
   0x5   :  { %v151_v10 = vld [vmem:[%s261_s2] ss:$0 sm:$0xff] }
   0x6   :  { %173 = vmatpush3.bf16.msra.mxu0 %v193_v2 }
   0x7   :  { %174 = vmatprep.subr.bf16.mxu0 %v201_v0 }
   0xa   :  { %175 = vmatpush3.bf16.msra.mxu0 %v194_v3 }
   0xb   :  { %176 = vmatprep.subr.bf16.mxu0 %v201_v0 }
   0xe   :  { %177 = vmatpush3.bf16.msra.mxu0 %v195_v4 }
   0xf   :  { %178 = vmatprep.subr.bf16.mxu0 %v201_v0 }
  0x12   :  { %179 = vmatpush3.bf16.msra.mxu0 %v196_v5 }
  0x13   :  { %180 = vmatprep.subr.bf16.mxu0 %v201_v0 }
  0x16   :  { %181 = vmatpush3.bf16.msra.mxu0 %v197_v6 }
  0x17   :  { %182 = vmatprep.subr.bf16.mxu0 %v201_v0 }
  0x1a   :  { %183 = vmatpush3.bf16.msra.mxu0 %v198_v7 }
  0x1b   :  { %184 = vmatprep.subr.bf16.mxu0 %v201_v0 }
  0x1e   :  { %185 = vmatpush3.bf16.msra.mxu0 %v199_v8 }
  0x21   :  { %187 = vmatmul.mubr.bf16.vlgmr.msra.gmra.mxu0 %v200_v9 }
  0xe1   :  { %v136_v11 = vpop.f32.mrf.mxu0 }
  0xe2   :  { %v143_v12 = vadd.f32 %v151_v10, %v136_v11 }
  0xe3   :  { %v188_v13 = vpop.f32.mrf.mxu0 }
  0xe4   :  { %145 = vst [vmem:[%s262_s3] sm:$0xff] %v143_v12 }
  0xe5   :  { %v139_v14 = vpop.f32.mrf.mxu0 }
  0xe6   :  { %v144_v15 = vadd.f32 %v151_v10, %v139_v14 }
  0xe7   :  { %v189_v16 = vpop.f32.mrf.mxu0 }
  0xe8   :  { %146 = vst [vmem:[%s262_s3 + $0x8] sm:$0xff] %v144_v15 }

</bundles_post_ra>
